<compile_context>
chip_gen: v7x
topology: tpu7x:2x2x1
jax: 0.10.0
libtpu: 0.0.40
codegen_flags: <defaults>
</compile_context>

<pallas_src>
import jax
import jax.numpy as jnp
from jax import lax
from jax.experimental import pallas as pl
from jax.experimental.pallas import tpu as pltpu

_LANE = 128
_SUBLANE = 8


def _round_up(n, m):
    return ((n + m - 1) // m) * m


def dan_kernel(pad_ref, text_ref, table_ref, w1t_ref, b1_ref, w2t_ref, b2_ref,
               out_ref, acc_ref):
    k = pl.program_id(1)
    nk = pl.num_programs(1)

    ids = text_ref[...]                           # (TB, L) int32, k-resident
    TB, L = ids.shape
    Vt = table_ref.shape[0]

    @pl.when(k == 0)
    def _init():
        acc_ref[...] = jnp.zeros_like(acc_ref)

    # counts[b, v] = #{l : ids[b, l] == k*Vt + v} for this vocab tile.
    # Accumulated at (TB, Vt); the (TB, L, Vt) one-hot is never materialized.
    # Padding tokens are counted too, matching torch.sum(embeddings, dim=1)
    # (the pad row is non-zero because weight.data is overwritten after init).
    vocab_row = k * Vt + lax.broadcasted_iota(jnp.int32, (1, Vt), 1)  # (1, Vt)
    counts = jnp.zeros((TB, Vt), jnp.float32)
    for pos in range(L):                          # L is static; fully unrolled
        counts = counts + (ids[:, pos:pos + 1] == vocab_row).astype(jnp.float32)
    # TODO(synk): for large L switch to lax.fori_loop with a partial unroll
    # factor (dynamic column loads) to keep the unrolled trace size bounded.

    # Bagged-sum contribution of this vocab tile on the MXU in bf16
    # (counts are integers <= L, exact in bf16 for L < 256).
    acc_ref[...] += jnp.dot(counts.astype(jnp.bfloat16), table_ref[...],
                            preferred_element_type=jnp.float32)   # (TB, Ep)

    @pl.when(k == nk - 1)
    def _finalize():
        pad = pad_ref[0]
        # lengths = (text != padding_index).sum(dim=1), guarded for all-pad rows.
        lengths = jnp.sum((ids != pad).astype(jnp.float32), axis=1,
                          keepdims=True)                           # (TB, 1)
        inv_len = pl.reciprocal(jnp.maximum(lengths, 1.0))
        bagged = acc_ref[...] * inv_len                            # (TB, Ep) f32

        # hidden = relu(Linear(E -> H)); logits = Linear(H -> C).
        hidden = jnp.maximum(
            jnp.dot(bagged.astype(jnp.bfloat16), w1t_ref[...],
                    preferred_element_type=jnp.float32) + b1_ref[...], 0.0)
        out_ref[...] = (jnp.dot(hidden.astype(jnp.bfloat16), w2t_ref[...],
                                preferred_element_type=jnp.float32)
                        + b2_ref[...])                             # (TB, Cp)


def dan_forward(text, padding_index, emb_table, w_hidden, b_hidden,
                w_out, b_out):
    """text: [B, L] int32. Weights follow PyTorch nn.Linear convention
    (w_hidden: [H, E], w_out: [C, H])."""
    B, L = text.shape
    V, E = emb_table.shape
    H = w_hidden.shape[0]
    C = w_out.shape[0]

    # --- fold the max_norm=10 renorm into the table here (plain XLA, once per
    #     weight set; functionally equivalent to lookup-time renorm for one
    #     forward pass). The kernel never recomputes it.
    table_f32 = emb_table.astype(jnp.float32)
    norm = jnp.sqrt(jnp.sum(table_f32 * table_f32, axis=1, keepdims=True))
    table_f32 = table_f32 * jnp.where(norm > 10.0, 10.0 / norm, 1.0)

    TB = min(_round_up(B, _SUBLANE), 128)   # batch tile (MXU M dim)
    Bp = _round_up(B, TB)
    Vt = min(_round_up(V, _LANE), 512)      # vocab tile streamed from HBM
    Vp = _round_up(V, Vt)
    Ep = _round_up(E, _LANE)
    Hp = _round_up(H, _LANE)
    Cp = _round_up(C, _LANE)

    def pad2(x, rows, cols, dtype):
        x = x.astype(jnp.float32)
        x = jnp.pad(x, ((0, rows - x.shape[0]), (0, cols - x.shape[1])))
        return x.astype(dtype)

    text_p = jnp.pad(text.astype(jnp.int32), ((0, Bp - B), (0, 0)),
                     constant_values=padding_index)
    table_p = pad2(table_f32, Vp, Ep, jnp.bfloat16)           # (Vp, Ep)
    w1t_p = pad2(w_hidden.T, Ep, Hp, jnp.bfloat16)            # (Ep, Hp)
    b1_p = pad2(b_hidden.reshape(1, H), 1, Hp, jnp.float32)   # (1, Hp)
    w2t_p = pad2(w_out.T, Hp, Cp, jnp.bfloat16)               # (Hp, Cp)
    b2_p = pad2(b_out.reshape(1, C), 1, Cp, jnp.float32)      # (1, Cp)
    pad = jnp.asarray([padding_index], dtype=jnp.int32)

    nb, nk = Bp // TB, Vp // Vt

    # Scoped-VMEM budget: ~2x (pipelined) inputs + output tile + accumulator,
    # with headroom; default scoped limit is only 16 MiB on v5e.
    block_bytes = (TB * L * 4 + Vt * Ep * 2 + Ep * Hp * 2 + Hp * 4
                   + Hp * Cp * 2 + Cp * 4 + TB * Cp * 4)
    vmem_limit = int(min(48 * 1024 * 1024,
                         max(16 * 1024 * 1024,
                             4 * block_bytes + TB * Ep * 4)))

    grid_spec = pltpu.PrefetchScalarGridSpec(
        num_scalar_prefetch=1,                 # padding_index -> SMEM
        grid=(nb, nk),                         # (batch tiles, vocab tiles)
        in_specs=[
            pl.BlockSpec((TB, L), lambda b, k, _p: (b, 0)),    # text, k-resident
            pl.BlockSpec((Vt, Ep), lambda b, k, _p: (k, 0)),   # table tile (HBM-pipelined)
            pl.BlockSpec((Ep, Hp), lambda b, k, _p: (0, 0)),   # W1^T, resident
            pl.BlockSpec((1, Hp), lambda b, k, _p: (0, 0)),    # b1
            pl.BlockSpec((Hp, Cp), lambda b, k, _p: (0, 0)),   # W2^T, resident
            pl.BlockSpec((1, Cp), lambda b, k, _p: (0, 0)),    # b2
        ],
        out_specs=pl.BlockSpec((TB, Cp), lambda b, k, _p: (b, 0)),
        scratch_shapes=[pltpu.VMEM((TB, Ep), jnp.float32)],    # bag accumulator
    )

    logits_p = pl.pallas_call(
        dan_kernel,
        out_shape=jax.ShapeDtypeStruct((Bp, Cp), jnp.float32),
        grid_spec=grid_spec,
        compiler_params=pltpu.CompilerParams(
            dimension_semantics=("parallel", "arbitrary"),
            vmem_limit_bytes=vmem_limit),
    )(pad, text_p, table_p, w1t_p, b1_p, w2t_p, b2_p)
    return logits_p[:B, :C]


def _init_params(key, vocab_size, embedding_dim, hidden_dim, num_classes):
    k_emb, k_w1, k_b1, k_w2, k_b2 = jax.random.split(key, 5)

    # Embedding: xavier_uniform_ over a (V, E) matrix (stand-in for GloVe).
    bound_e = jnp.sqrt(6.0 / (vocab_size + embedding_dim))
    emb = jax.random.uniform(k_emb, (vocab_size, embedding_dim),
                             jnp.float32, -bound_e, bound_e)

    # nn.Linear default init: U(-1/sqrt(fan_in), 1/sqrt(fan_in)).
    b1_bound = 1.0 / jnp.sqrt(embedding_dim)
    w_hidden = jax.random.uniform(k_w1, (hidden_dim, embedding_dim),
                                  jnp.float32, -b1_bound, b1_bound)
    b_hidden = jax.random.uniform(k_b1, (hidden_dim,),
                                  jnp.float32, -b1_bound, b1_bound)

    b2_bound = 1.0 / jnp.sqrt(hidden_dim)
    w_out = jax.random.uniform(k_w2, (num_classes, hidden_dim),
                               jnp.float32, -b2_bound, b2_bound)
    b_out = jax.random.uniform(k_b2, (num_classes,),
                               jnp.float32, -b2_bound, b2_bound)
    return emb, w_hidden, b_hidden, w_out, b_out


if __name__ == "__main__":
    VOCAB_SIZE = 32
    EMBEDDING_DIM = 16
    HIDDEN_DIM = 32
    NUM_CLASSES = 4
    BATCH = 2
    SEQ_LEN = 8
    PADDING_INDEX = 0

    key = jax.random.PRNGKey(0)
    k_params, k_text = jax.random.split(key)

    emb, w_hidden, b_hidden, w_out, b_out = _init_params(
        k_params, VOCAB_SIZE, EMBEDDING_DIM, HIDDEN_DIM, NUM_CLASSES)

    # Token ids in [1, V); pad the tail of each row with PADDING_INDEX.
    text = jax.random.randint(k_text, (BATCH, SEQ_LEN), 1, VOCAB_SIZE,
                              dtype=jnp.int32)
    text = text.at[:, -2:].set(PADDING_INDEX)   # real lengths = SEQ_LEN - 2

    logits = dan_forward(text, PADDING_INDEX, emb, w_hidden, b_hidden,
                         w_out, b_out)
    jax.block_until_ready(logits)

    # Pure-JAX f32 reference of the PyTorch forward (renormed embedding lookup,
    # pad-inclusive sum / non-pad length average, ReLU MLP).
    norm = jnp.linalg.norm(emb, axis=1, keepdims=True)
    emb_rn = emb * jnp.where(norm > 10.0, 10.0 / norm, 1.0)
    embeddings = emb_rn[text]                                   # (B, L, E)
    lengths = (text != PADDING_INDEX).sum(axis=1, keepdims=True).astype(jnp.float32)
    bagged = embeddings.sum(axis=1) / lengths
    hidden_ref = jnp.maximum(bagged @ w_hidden.T + b_hidden, 0.0)
    logits_ref = hidden_ref @ w_out.T + b_out

    assert logits.shape == (BATCH, NUM_CLASSES)
    # Kernel uses bf16 MXU operands with f32 accumulation -> loosened tolerance
    # against the pure-f32 reference.
    assert jnp.allclose(logits, logits_ref, atol=3e-2, rtol=3e-2)
    print("KERNEL_OK")
</pallas_src>

<mosaic_0001>
module attributes {stable_mosaic.version = 11 : i64} {
  func.func @dan_kernel(%arg0: i32, %arg1: i32, %arg2: memref<1xi32, #tpu.memory_space<smem>>, %arg3: memref<8x8xi32, #tpu.memory_space<vmem>>, %arg4: memref<128x128xbf16, #tpu.memory_space<vmem>>, %arg5: memref<128x128xbf16, #tpu.memory_space<vmem>>, %arg6: memref<1x128xf32, #tpu.memory_space<vmem>>, %arg7: memref<128x128xbf16, #tpu.memory_space<vmem>>, %arg8: memref<1x128xf32, #tpu.memory_space<vmem>>, %arg9: memref<8x128xf32, #tpu.memory_space<vmem>>, %arg10: memref<8x128xf32, #tpu.memory_space<vmem>>) attributes {dimension_semantics = [#tpu.dimension_semantics<parallel>, #tpu.dimension_semantics<arbitrary>], iteration_bounds = array<i64: 1, 1>, scalar_prefetch = 1 : i64, scratch_operands = 1 : i64, tpu.core_type = #tpu.core_type<tc>, window_params = [{transform_indices = @transform_0, window_bounds = array<i64: 8, 8>}, {transform_indices = @transform_1, window_bounds = array<i64: 128, 128>}, {pipeline_mode = #tpu.pipeline_mode<synchronous>, transform_indices = @transform_2, window_bounds = array<i64: 128, 128>}, {pipeline_mode = #tpu.pipeline_mode<synchronous>, transform_indices = @transform_3, window_bounds = array<i64: 1, 128>}, {pipeline_mode = #tpu.pipeline_mode<synchronous>, transform_indices = @transform_4, window_bounds = array<i64: 128, 128>}, {pipeline_mode = #tpu.pipeline_mode<synchronous>, transform_indices = @transform_5, window_bounds = array<i64: 1, 128>}, {transform_indices = @transform_6, window_bounds = array<i64: 8, 128>}]} {
    %c0 = arith.constant 0 : index
    %c0_0 = arith.constant 0 : index
    %0 = vector.load %arg3[%c0, %c0_0] : memref<8x8xi32, #tpu.memory_space<vmem>>, vector<8x8xi32>
    %c0_i32 = arith.constant 0 : i32
    %1 = arith.cmpi eq, %arg1, %c0_i32 : i32
    %2 = arith.extui %1 : i1 to i32
    %c0_i32_1 = arith.constant 0 : i32
    %3 = arith.cmpi ne, %2, %c0_i32_1 : i32
    scf.if %3 {
      %cst_11 = arith.constant 0.000000e+00 : f32
      %74 = vector.broadcast %cst_11 : f32 to vector<8x128xf32>
      %c0_12 = arith.constant 0 : index
      %c0_13 = arith.constant 0 : index
      %75 = vector.load %arg10[%c0_12, %c0_13] : memref<8x128xf32, #tpu.memory_space<vmem>>, vector<8x128xf32>
      tpu.vector_store %arg10[%c0_12, %c0_13], %74 {strides = array<i32>} : memref<8x128xf32, #tpu.memory_space<vmem>>, vector<8x128xf32>,
    } else {
    }
    %c128_i32 = arith.constant 128 : i32
    %4 = arith.muli %arg1, %c128_i32 : i32
    %5 = tpu.iota {dimensions = array<i32: 1>} : vector<1x128xi32>
    %6 = vector.broadcast %4 : i32 to vector<1x128xi32>
    %7 = arith.addi %6, %5 : vector<1x128xi32>
    %cst = arith.constant 0.000000e+00 : f32
    %8 = vector.broadcast %cst : f32 to vector<8x128xf32>
    %9 = vector.extract_strided_slice %0 {offsets = [0, 0], sizes = [8, 1], strides = [1, 1]} : vector<8x8xi32> to vector<8x1xi32>
    %10 = vector.broadcast %9 : vector<8x1xi32> to vector<8x128xi32>
    %11 = vector.broadcast %7 : vector<1x128xi32> to vector<8x128xi32>
    %12 = arith.cmpi eq, %10, %11 : vector<8x128xi32>
    %13 = arith.extui %12 : vector<8x128xi1> to vector<8x128xi32>
    %14 = arith.sitofp %13 : vector<8x128xi32> to vector<8x128xf32>
    %15 = arith.addf %8, %14 : vector<8x128xf32>
    %16 = vector.extract_strided_slice %0 {offsets = [0, 1], sizes = [8, 1], strides = [1, 1]} : vector<8x8xi32> to vector<8x1xi32>
    %17 = vector.broadcast %16 : vector<8x1xi32> to vector<8x128xi32>
    %18 = vector.broadcast %7 : vector<1x128xi32> to vector<8x128xi32>
    %19 = arith.cmpi eq, %17, %18 : vector<8x128xi32>
    %20 = arith.extui %19 : vector<8x128xi1> to vector<8x128xi32>
    %21 = arith.sitofp %20 : vector<8x128xi32> to vector<8x128xf32>
    %22 = arith.addf %15, %21 : vector<8x128xf32>
    %23 = vector.extract_strided_slice %0 {offsets = [0, 2], sizes = [8, 1], strides = [1, 1]} : vector<8x8xi32> to vector<8x1xi32>
    %24 = vector.broadcast %23 : vector<8x1xi32> to vector<8x128xi32>
    %25 = vector.broadcast %7 : vector<1x128xi32> to vector<8x128xi32>
    %26 = arith.cmpi eq, %24, %25 : vector<8x128xi32>
    %27 = arith.extui %26 : vector<8x128xi1> to vector<8x128xi32>
    %28 = arith.sitofp %27 : vector<8x128xi32> to vector<8x128xf32>
    %29 = arith.addf %22, %28 : vector<8x128xf32>
    %30 = vector.extract_strided_slice %0 {offsets = [0, 3], sizes = [8, 1], strides = [1, 1]} : vector<8x8xi32> to vector<8x1xi32>
    %31 = vector.broadcast %30 : vector<8x1xi32> to vector<8x128xi32>
    %32 = vector.broadcast %7 : vector<1x128xi32> to vector<8x128xi32>
    %33 = arith.cmpi eq, %31, %32 : vector<8x128xi32>
    %34 = arith.extui %33 : vector<8x128xi1> to vector<8x128xi32>
    %35 = arith.sitofp %34 : vector<8x128xi32> to vector<8x128xf32>
    %36 = arith.addf %29, %35 : vector<8x128xf32>
    %37 = vector.extract_strided_slice %0 {offsets = [0, 4], sizes = [8, 1], strides = [1, 1]} : vector<8x8xi32> to vector<8x1xi32>
    %38 = vector.broadcast %37 : vector<8x1xi32> to vector<8x128xi32>
    %39 = vector.broadcast %7 : vector<1x128xi32> to vector<8x128xi32>
    %40 = arith.cmpi eq, %38, %39 : vector<8x128xi32>
    %41 = arith.extui %40 : vector<8x128xi1> to vector<8x128xi32>
    %42 = arith.sitofp %41 : vector<8x128xi32> to vector<8x128xf32>
    %43 = arith.addf %36, %42 : vector<8x128xf32>
    %44 = vector.extract_strided_slice %0 {offsets = [0, 5], sizes = [8, 1], strides = [1, 1]} : vector<8x8xi32> to vector<8x1xi32>
    %45 = vector.broadcast %44 : vector<8x1xi32> to vector<8x128xi32>
    %46 = vector.broadcast %7 : vector<1x128xi32> to vector<8x128xi32>
    %47 = arith.cmpi eq, %45, %46 : vector<8x128xi32>
    %48 = arith.extui %47 : vector<8x128xi1> to vector<8x128xi32>
    %49 = arith.sitofp %48 : vector<8x128xi32> to vector<8x128xf32>
    %50 = arith.addf %43, %49 : vector<8x128xf32>
    %51 = vector.extract_strided_slice %0 {offsets = [0, 6], sizes = [8, 1], strides = [1, 1]} : vector<8x8xi32> to vector<8x1xi32>
    %52 = vector.broadcast %51 : vector<8x1xi32> to vector<8x128xi32>
    %53 = vector.broadcast %7 : vector<1x128xi32> to vector<8x128xi32>
    %54 = arith.cmpi eq, %52, %53 : vector<8x128xi32>
    %55 = arith.extui %54 : vector<8x128xi1> to vector<8x128xi32>
    %56 = arith.sitofp %55 : vector<8x128xi32> to vector<8x128xf32>
    %57 = arith.addf %50, %56 : vector<8x128xf32>
    %58 = vector.extract_strided_slice %0 {offsets = [0, 7], sizes = [8, 1], strides = [1, 1]} : vector<8x8xi32> to vector<8x1xi32>
    %59 = vector.broadcast %58 : vector<8x1xi32> to vector<8x128xi32>
    %60 = vector.broadcast %7 : vector<1x128xi32> to vector<8x128xi32>
    %61 = arith.cmpi eq, %59, %60 : vector<8x128xi32>
    %62 = arith.extui %61 : vector<8x128xi1> to vector<8x128xi32>
    %63 = arith.sitofp %62 : vector<8x128xi32> to vector<8x128xf32>
    %64 = arith.addf %57, %63 : vector<8x128xf32>
    %c0_2 = arith.constant 0 : index
    %c0_3 = arith.constant 0 : index
    %65 = vector.load %arg10[%c0_2, %c0_3] : memref<8x128xf32, #tpu.memory_space<vmem>>, vector<8x128xf32>
    %66 = arith.truncf %64 : vector<8x128xf32> to vector<8x128xbf16>
    %c0_4 = arith.constant 0 : index
    %c0_5 = arith.constant 0 : index
    %67 = vector.load %arg4[%c0_4, %c0_5] : memref<128x128xbf16, #tpu.memory_space<vmem>>, vector<128x128xbf16>
    %cst_6 = arith.constant dense<0.000000e+00> : vector<8x128xf32>
    %68 = tpu.matmul %66, %67, %cst_6 {dimension_numbers = #tpu.dot_dimension_numbers<[1], [0], [0], [1], [0, 0, 1, 1], [], []>} : vector<8x128xbf16>, vector<128x128xbf16>, vector<8x128xf32> -> vector<8x128xf32>
    %69 = arith.addf %65, %68 : vector<8x128xf32>
    %c0_7 = arith.constant 0 : index
    %c0_8 = arith.constant 0 : index
    %70 = vector.load %arg10[%c0_7, %c0_8] : memref<8x128xf32, #tpu.memory_space<vmem>>, vector<8x128xf32>
    tpu.vector_store %arg10[%c0_7, %c0_8], %69 {strides = array<i32>} : memref<8x128xf32, #tpu.memory_space<vmem>>, vector<8x128xf32>,
    %c0_i32_9 = arith.constant 0 : i32
    %71 = arith.cmpi eq, %arg1, %c0_i32_9 : i32
    %72 = arith.extui %71 : i1 to i32
    %c0_i32_10 = arith.constant 0 : i32
    %73 = arith.cmpi ne, %72, %c0_i32_10 : i32
    scf.if %73 {
      %c0_11 = arith.constant 0 : index
      %74 = memref.load %arg2[%c0_11] : memref<1xi32, #tpu.memory_space<smem>>
      %75 = vector.broadcast %74 : i32 to vector<8x8xi32>
      %76 = arith.cmpi ne, %0, %75 : vector<8x8xi32>
      %77 = arith.extui %76 : vector<8x8xi1> to vector<8x8xi32>
      %78 = arith.sitofp %77 : vector<8x8xi32> to vector<8x8xf32>
      %cst_12 = arith.constant dense<0.000000e+00> : vector<8xf32>
      %79 = vector.multi_reduction <add>, %78, %cst_12 [1] : vector<8x8xf32> to vector<8xf32>
      %80 = vector.shape_cast %79 : vector<8xf32> to vector<8x1xf32>
      %cst_13 = arith.constant 1.000000e+00 : f32
      %81 = vector.broadcast %cst_13 : f32 to vector<8x1xf32>
      %82 = arith.maximumf %80, %81 : vector<8x1xf32>
      %83 = tpu.reciprocal %82 : vector<8x1xf32> -> vector<8x1xf32>
      %c0_14 = arith.constant 0 : index
      %c0_15 = arith.constant 0 : index
      %84 = vector.load %arg10[%c0_14, %c0_15] : memref<8x128xf32, #tpu.memory_space<vmem>>, vector<8x128xf32>
      %85 = vector.broadcast %83 : vector<8x1xf32> to vector<8x128xf32>
      %86 = arith.mulf %84, %85 : vector<8x128xf32>
      %87 = arith.truncf %86 : vector<8x128xf32> to vector<8x128xbf16>
      %c0_16 = arith.constant 0 : index
      %c0_17 = arith.constant 0 : index
      %88 = vector.load %arg5[%c0_16, %c0_17] : memref<128x128xbf16, #tpu.memory_space<vmem>>, vector<128x128xbf16>
      %cst_18 = arith.constant dense<0.000000e+00> : vector<8x128xf32>
      %89 = tpu.matmul %87, %88, %cst_18 {dimension_numbers = #tpu.dot_dimension_numbers<[1], [0], [0], [1], [0, 0, 1, 1], [], []>} : vector<8x128xbf16>, vector<128x128xbf16>, vector<8x128xf32> -> vector<8x128xf32>
      %c0_19 = arith.constant 0 : index
      %c0_20 = arith.constant 0 : index
      %90 = vector.load %arg6[%c0_19, %c0_20] : memref<1x128xf32, #tpu.memory_space<vmem>>, vector<1x128xf32>
      %91 = vector.broadcast %90 : vector<1x128xf32> to vector<8x128xf32>
      %92 = arith.addf %89, %91 : vector<8x128xf32>
      %cst_21 = arith.constant 0.000000e+00 : f32
      %93 = vector.broadcast %cst_21 : f32 to vector<8x128xf32>
      %94 = arith.maximumf %92, %93 : vector<8x128xf32>
      %95 = arith.truncf %94 : vector<8x128xf32> to vector<8x128xbf16>
      %c0_22 = arith.constant 0 : index
      %c0_23 = arith.constant 0 : index
      %96 = vector.load %arg7[%c0_22, %c0_23] : memref<128x128xbf16, #tpu.memory_space<vmem>>, vector<128x128xbf16>
      %cst_24 = arith.constant dense<0.000000e+00> : vector<8x128xf32>
      %97 = tpu.matmul %95, %96, %cst_24 {dimension_numbers = #tpu.dot_dimension_numbers<[1], [0], [0], [1], [0, 0, 1, 1], [], []>} : vector<8x128xbf16>, vector<128x128xbf16>, vector<8x128xf32> -> vector<8x128xf32>
      %c0_25 = arith.constant 0 : index
      %c0_26 = arith.constant 0 : index
      %98 = vector.load %arg8[%c0_25, %c0_26] : memref<1x128xf32, #tpu.memory_space<vmem>>, vector<1x128xf32>
      %99 = vector.broadcast %98 : vector<1x128xf32> to vector<8x128xf32>
      %100 = arith.addf %97, %99 : vector<8x128xf32>
      %c0_27 = arith.constant 0 : index
      %c0_28 = arith.constant 0 : index
      %101 = vector.load %arg9[%c0_27, %c0_28] : memref<8x128xf32, #tpu.memory_space<vmem>>, vector<8x128xf32>
      tpu.vector_store %arg9[%c0_27, %c0_28], %100 {strides = array<i32>} : memref<8x128xf32, #tpu.memory_space<vmem>>, vector<8x128xf32>,
    } else {
    }
    return
  }
  func.func @transform_0(%arg0: i32, %arg1: i32, %arg2: memref<1xi32, #tpu.memory_space<smem>>) -> (i32, i32) {
    %c0_i32 = arith.constant 0 : i32
    %c0_i32_0 = arith.constant 0 : i32
    return %arg0, %c0_i32 : i32, i32
  }
  func.func @transform_1(%arg0: i32, %arg1: i32, %arg2: memref<1xi32, #tpu.memory_space<smem>>) -> (i32, i32) {
    %c0_i32 = arith.constant 0 : i32
    %c0_i32_0 = arith.constant 0 : i32
    return %arg1, %c0_i32 : i32, i32
  }
  func.func @transform_2(%arg0: i32, %arg1: i32, %arg2: memref<1xi32, #tpu.memory_space<smem>>) -> (i32, i32) {
    %c0_i32 = arith.constant 0 : i32
    %c0_i32_0 = arith.constant 0 : i32
    %c0_i32_1 = arith.constant 0 : i32
    return %c0_i32, %c0_i32_0 : i32, i32
  }
  func.func @transform_3(%arg0: i32, %arg1: i32, %arg2: memref<1xi32, #tpu.memory_space<smem>>) -> (i32, i32) {
    %c0_i32 = arith.constant 0 : i32
    %c0_i32_0 = arith.constant 0 : i32
    %c0_i32_1 = arith.constant 0 : i32
    return %c0_i32, %c0_i32_0 : i32, i32
  }
  func.func @transform_4(%arg0: i32, %arg1: i32, %arg2: memref<1xi32, #tpu.memory_space<smem>>) -> (i32, i32) {
    %c0_i32 = arith.constant 0 : i32
    %c0_i32_0 = arith.constant 0 : i32
    %c0_i32_1 = arith.constant 0 : i32
    return %c0_i32, %c0_i32_0 : i32, i32
  }
  func.func @transform_5(%arg0: i32, %arg1: i32, %arg2: memref<1xi32, #tpu.memory_space<smem>>) -> (i32, i32) {
    %c0_i32 = arith.constant 0 : i32
    %c0_i32_0 = arith.constant 0 : i32
    %c0_i32_1 = arith.constant 0 : i32
    return %c0_i32, %c0_i32_0 : i32, i32
  }
  func.func @transform_6(%arg0: i32, %arg1: i32, %arg2: memref<1xi32, #tpu.memory_space<smem>>) -> (i32, i32) {
    %c0_i32 = arith.constant 0 : i32
    %c0_i32_0 = arith.constant 0 : i32
    return %arg0, %c0_i32 : i32, i32
  }
}

</mosaic_0001>

<bundles_post_ra>
// kernel: tpu_custom_call.1
= control target key start
LH: loop header
LB: loop body
LE: loop exit
PB: predicated region body
PF: predicated region fallthrough
CT: control target
= control target key end

     0   :  { %13 = vsyncpa [#allocation6], 0  ;;  %s980_s0 = inlined_call_operand.<no memory space> [shape: s32[1], index: 0, kind: input, shape index: {}]   ;;  %s981_s1 = inlined_call_operand.hbm [shape: s32[8,8], index: 1, kind: input, shape index: {}]   ;;  %s982_s2 = inlined_call_operand.hbm [shape: bf16[128,128], index: 2, kind: input, shape index: {}]   ;;  %s983_s3 = inlined_call_operand.hbm [shape: bf16[128,128], index: 3, kind: input, shape index: {}]   ;;  %s984_s4 = inlined_call_operand.vmem [shape: f32[1,128], index: 4, kind: input, shape index: {}]   ;;  %s985_s5 = inlined_call_operand.hbm [shape: bf16[128,128], index: 5, kind: input, shape index: {}]   ;;  %s986_s6 = inlined_call_operand.vmem [shape: f32[1,128], index: 6, kind: input, shape index: {}]   ;;  %s987_s7 = inlined_call_operand.hbm [shape: f32[8,128], index: 7, kind: output, shape index: {}]  }
   0x1   :  { %14 = vsyncpa [#allocation9], 0 }
   0x2   :  { %15 = vsyncpa [#allocation12], 0 }
   0x3   :  { %16 = vsyncpa [#allocation7], 0  ;;  %s806_s24 = smov [#allocation8]   ;;  %s688_s28 = scalar_lea.hbm %s982_s2, 1024 }
   0x4   :  { %s32_s25 = sshll.u32 %s806_s24, 4  ;;  %p689_p0 = scmp.ne.s32.totalorder %s982_s2, %s688_s28  ;;  %s33_s25 = int_to_ptr.vmem [resolvable:$true] %s32_s25 }
   0x5   :  { %p692_p1 = scmp.lt.u32.totalorder %s688_s28, %s982_s2 }
   0x7   :  { %p694_p2 = pnand %p692_p1, %p689_p0 }
   0x9   :  { %697 = shalt.err (!%p694_p2)
}
   0xa   :  { %s698_s10 = scalar_lea.vmem %s33_s25, 1024  ;;  %p703_p4 = scmp.lt.s32.totalorder %s33_s25, %s33_s25 }
   0xb   :  { %p699_p3 = scmp.ne.s32.totalorder %s33_s25, %s698_s10  ;;  %p704_p5 = scmp.lt.s32.totalorder %s698_s10, %s698_s10 }
   0xd   :  { %p705_p6 = por %p704_p5, %p703_p4 }
   0xf   :  { %p706_p7 = pnand %p705_p6, %p699_p3 }
  0x11   :  { %709 = shalt.err (!%p706_p7)
}
  0x12   :  { %s807_s11 = smov 64   ;;  %s808_s12 = smov 4  }
  0x13   :  { %38 = dma.hbm_to_vmem [thread:$0]  %s982_s2, 1024, %s33_s25, [#allocation9], %s807_s11, %s807_s11, %s808_s12  }
  0x14   :  { %s809_s15 = smov [#allocation5]   ;;  %s810_s17 = smov [#allocation10]  }
  0x15   :  { %s23_s16 = sshll.u32 %s809_s15, 4  ;;  %s44_s18 = sshll.u32 %s810_s17, 4  ;;  %s24_s16 = int_to_ptr.vmem [resolvable:$true] %s23_s16  ;;  %s45_s18 = int_to_ptr.vmem [resolvable:$true] %s44_s18 }
  0x16   :  { %s710_s21 = scalar_lea.hbm %s981_s1, 128 }
  0x17   :  { %p711_p8 = scmp.ne.s32.totalorder %s981_s1, %s710_s21  ;;  %p714_p9 = scmp.lt.u32.totalorder %s710_s21, %s981_s1 }
  0x19   :  { %p716_p10 = pnand %p714_p9, %p711_p8 }
  0x1b   :  { %719 = shalt.err (!%p716_p10)
}
  0x1c   :  { %s720_s2 = scalar_lea.vmem %s24_s16, 128  ;;  %p725_p12 = scmp.lt.s32.totalorder %s24_s16, %s24_s16 }
  0x1d   :  { %p721_p11 = scmp.ne.s32.totalorder %s24_s16, %s720_s2  ;;  %p726_p13 = scmp.lt.s32.totalorder %s720_s2, %s720_s2 }
  0x1f   :  { %p727_p0 = por %p726_p13, %p725_p12 }
  0x21   :  { %p728_p1 = pnand %p727_p0, %p721_p11 }
  0x23   :  { %731 = shalt.err (!%p728_p1)
}
  0x24   :  { %26 = dma.hbm_to_vmem [thread:$0]  %s981_s1, 128, %s24_s16, [#allocation6]  }
  0x25   :  { %s732_s30 = scalar_lea.hbm %s983_s3, 1024 }
  0x26   :  { %p733_p2 = scmp.ne.s32.totalorder %s983_s3, %s732_s30  ;;  %p736_p3 = scmp.lt.u32.totalorder %s732_s30, %s983_s3 }
  0x28   :  { %p738_p4 = pnand %p736_p3, %p733_p2 }
  0x2a   :  { %741 = shalt.err (!%p738_p4)
}
  0x2b   :  { %s742_s14 = scalar_lea.vmem %s45_s18, 1024  ;;  %p747_p6 = scmp.lt.s32.totalorder %s45_s18, %s45_s18 }
  0x2c   :  { %p743_p5 = scmp.ne.s32.totalorder %s45_s18, %s742_s14  ;;  %p748_p7 = scmp.lt.s32.totalorder %s742_s14, %s742_s14 }
  0x2e   :  { %p749_p8 = por %p748_p7, %p747_p6 }
  0x30   :  { %p750_p9 = pnand %p749_p8, %p743_p5 }
  0x32   :  { %753 = shalt.err (!%p750_p9)
}
  0x33   :  { %50 = dma.hbm_to_vmem [thread:$0]  %s983_s3, 1024, %s45_s18, [#allocation9], %s807_s11, %s807_s11, %s808_s12  }
  0x34   :  { %s811_s16 = smov [#allocation11]   ;;  %s754_s21 = scalar_lea.hbm %s985_s5, 1024 }
  0x35   :  { %s58_s17 = sshll.u32 %s811_s16, 4  ;;  %p755_p10 = scmp.ne.s32.totalorder %s985_s5, %s754_s21  ;;  %s59_s17 = int_to_ptr.vmem [resolvable:$true] %s58_s17 }
  0x36   :  { %p758_p11 = scmp.lt.u32.totalorder %s754_s21, %s985_s5 }
  0x38   :  { %p760_p12 = pnand %p758_p11, %p755_p10 }
  0x3a   :  { %763 = shalt.err (!%p760_p12)
}
  0x3b   :  { %s764_s2 = scalar_lea.vmem %s59_s17, 1024  ;;  %p769_p0 = scmp.lt.s32.totalorder %s59_s17, %s59_s17 }
  0x3c   :  { %p765_p13 = scmp.ne.s32.totalorder %s59_s17, %s764_s2  ;;  %p770_p1 = scmp.lt.s32.totalorder %s764_s2, %s764_s2 }
  0x3e   :  { %p771_p2 = por %p770_p1, %p769_p0 }
  0x40   :  { %p772_p3 = pnand %p771_p2, %p765_p13 }
  0x42   :  { %775 = shalt.err (!%p772_p3)
}
  0x43   :  { %64 = dma.hbm_to_vmem [thread:$0]  %s985_s5, 1024, %s59_s17, [#allocation12], %s807_s11, %s807_s11, %s808_s12  }
  0x44   :  { %798 = dma.done.wait [#allocation6], 128  }
  0x45   :  { %799 = vsyncadd [#allocation6], 4294967168 }
  0x46   :  { %800 = dma.done.wait [#allocation9], 2048  }
  0x47   :  { %801 = vsyncadd [#allocation9], 4294965248 }
  0x48   :  { %802 = dma.done.wait [#allocation12], 1024  }
  0x49   :  { %803 = vsyncadd [#allocation12], 4294966272  ;;  %v812_v0 = vmov 2   ;;  %v813_v1 = vmov 0   ;;  %v814_v2 = vmov 0.0   ;;  %v80_v3 = vld [vmem:[#allocation5] sm:$0xff]  ;;  %v259_v20 = vstv %s980_s0 }
  0x4a   :  { %655 = vset.pattern.permute.xlu1 %v812_v0  ;;  %653 = vset.pattern.permute.xlu0 %v813_v1  ;;  %v662_v4 = vld [vmem:[#allocation8] sm:$0xff]   ;;  %v663_v5 = vld [vmem:[#allocation8 + $0x8] sm:$0xff]   ;;  %v815_v6 = vmov 3   ;;  %v816_v7 = vmov 1   ;;  %v664_v8 = vld [vmem:[#allocation8 + $0x10] sm:$0xff]   ;;  %v817_v9 = vmov 4   ;;  %vm260_vm1 = vcmp.ne.s32.totalorder %v80_v3, %v259_v20 }
  0x4b   :  { %576 = vmatprep.subr.bf16.mxu0 %v814_v2  ;;  %596 = vmatprep.subr.bf16.mxu1 %v814_v2  ;;  %v818_v10 = vmov 5   ;;  %v665_v11 = vld [vmem:[#allocation8 + $0x18] sm:$0xff]   ;;  %v666_v12 = vld [vmem:[#allocation8 + $0x20] sm:$0xff]   ;;  %v819_v13 = vmov 6   ;;  %v820_v14 = vmov 7   ;;  %v667_v15 = vld [vmem:[#allocation8 + $0x28] sm:$0xff]   ;;  %v87_v28 = vlaneseq }
  0x4c   :  { %106 = vperm.xlu1 %655, %v80_v3   ;;  %92 = vperm.xlu0 %653, %v80_v3   ;;  %v668_v16 = vld [vmem:[#allocation8 + $0x30] sm:$0xff]   ;;  %vm821_vm0 = vmmov 0   ;;  %v670_v17 = vld [vmem:[#allocation10] sm:$0xff]   ;;  %v669_v18 = vld [vmem:[#allocation8 + $0x38] sm:$0xff]   ;;  %v530_v22 = vsel %vm260_vm1, 1.0, %v814_v2  ;;  %vm263_vm2 = vcmask 64512  }
  0x4d   :  { %577 = vmatpush3.bf16.msra.mxu0 %v662_v4  ;;  %592 = vmatprep.mubr.msk.bf16.mxu0 %vm821_vm0, %v814_v2  ;;  %v671_v19 = vld [vmem:[#allocation10 + $0x8] sm:$0xff]   ;;  %v672_v21 = vld [vmem:[#allocation10 + $0x10] sm:$0xff]   ;;  %v673_v23 = vld [vmem:[#allocation10 + $0x18] sm:$0xff]   ;;  %v264_v24 = vsel %vm263_vm2, %v530_v22, 0.0  ;;  %v88_v31 = vand.u32 127, %v87_v28  ;;  %s822_s28 = smov [#allocation13]  }
  0x4e   :  { %578 = vmatprep.subr.bf16.mxu0 %v814_v2  ;;  %612 = vmatprep.mubr.msk.bf16.mxu1 %vm821_vm0, %v814_v2  ;;  %v674_v25 = vld [vmem:[#allocation10 + $0x20] sm:$0xff]   ;;  %v675_v26 = vld [vmem:[#allocation10 + $0x28] sm:$0xff]   ;;  %v676_v27 = vld [vmem:[#allocation10 + $0x30] sm:$0xff]   ;;  %s503_s29 = sshll.u32 %s822_s28, 4  ;;  %s504_s29 = int_to_ptr.vmem [resolvable:$true] %s503_s29 }
  0x4f   :  { %597 = vmatpush3.bf16.msra.mxu1 %v670_v17  ;;  %v677_v54 = vld [vmem:[#allocation10 + $0x38] sm:$0xff]   ;;  %v678_v55 = vld [vmem:[#allocation11] sm:$0xff]   ;;  %v679_v56 = vld [vmem:[#allocation11 + $0x8] sm:$0xff]   ;;  %p781_p5 = scmp.lt.s32.totalorder %s504_s29, %s504_s29 }
  0x50   :  { %656 = vset.pattern.permute.xlu1 %v815_v6  ;;  %654 = vset.pattern.permute.xlu0 %v816_v7  ;;  %v680_v57 = vld [vmem:[#allocation11 + $0x10] sm:$0xff]   ;;  %v681_v58 = vld [vmem:[#allocation11 + $0x18] sm:$0xff]   ;;  %v682_v59 = vld [vmem:[#allocation11 + $0x20] sm:$0xff]  }
  0x51   :  { %113 = vperm.xlu1 %656, %v80_v3   ;;  %99 = vperm.xlu0 %654, %v80_v3   ;;  %v683_v60 = vld [vmem:[#allocation11 + $0x28] sm:$0xff]   ;;  %v684_v7 = vld [vmem:[#allocation11 + $0x30] sm:$0xff]   ;;  %v540_v17 = vld [vmem:[%s986_s6] ss:$0 sm:$0xff] }
  0x52   :  { %579 = vmatpush3.bf16.msra.mxu0 %v663_v5  ;;  %598 = vmatprep.subr.bf16.mxu1 %v814_v2 }
  0x53   :  { %580 = vmatprep.subr.bf16.mxu0 %v814_v2  ;;  %599 = vmatpush3.bf16.msra.mxu1 %v671_v19 }
  0x54   :  { %600 = vmatprep.subr.bf16.mxu1 %v814_v2 }
  0x55   :  { %657 = vset.pattern.permute.xlu1 %v817_v9  ;;  %658 = vset.pattern.permute.xlu0 %v818_v10  ;;  %v531_v9 = vld [vmem:[%s984_s4] ss:$0 sm:$0xff]  ;;  %s776_s4 = scalar_lea.vmem %s504_s29, 128 }
  0x56   :  { %120 = vperm.xlu1 %657, %v80_v3   ;;  %127 = vperm.xlu0 %658, %v80_v3   ;;  %p777_p4 = scmp.ne.s32.totalorder %s504_s29, %s776_s4  ;;  %p782_p6 = scmp.lt.s32.totalorder %s776_s4, %s776_s4 }
  0x57   :  { %581 = vmatpush3.bf16.msra.mxu0 %v664_v8  ;;  %601 = vmatpush3.bf16.msra.mxu1 %v672_v21  ;;  %v685_v8 = vld [vmem:[#allocation11 + $0x38] sm:$0xff]  }
  0x58   :  { %582 = vmatprep.subr.bf16.mxu0 %v814_v2  ;;  %602 = vmatprep.subr.bf16.mxu1 %v814_v2  ;;  %p783_p7 = por %p782_p6, %p781_p5 }
  0x5a   :  { %659 = vset.pattern.permute.xlu1 %v819_v13  ;;  %661 = vset.pattern.permute.xlu0 %v820_v14  ;;  %p784_p8 = pnand %p783_p7, %p777_p4 }
  0x5b   :  { %134 = vperm.xlu1 %659, %v80_v3   ;;  %583 = vmatpush3.bf16.msra.mxu0 %v665_v11 }
  0x5c   :  { %584 = vmatprep.subr.bf16.mxu0 %v814_v2  ;;  %603 = vmatpush3.bf16.msra.mxu1 %v673_v23 }
  0x5d   :  { %604 = vmatprep.subr.bf16.mxu1 %v814_v2 }
  0x5f   :  { %660 = vset.pattern.permute.xlu1 %v820_v14  ;;  %585 = vmatpush3.bf16.msra.mxu0 %v666_v12 }
  0x60   :  { %141 = vperm.xlu1 %660, %v80_v3   ;;  %586 = vmatprep.subr.bf16.mxu0 %v814_v2 }
  0x61   :  { %605 = vmatpush3.bf16.msra.mxu1 %v674_v25 }
  0x62   :  { %606 = vmatprep.subr.bf16.mxu1 %v814_v2 }
  0x63   :  { %587 = vmatpush3.bf16.msra.mxu0 %v667_v15 }
  0x64   :  { %588 = vmatprep.subr.bf16.mxu0 %v814_v2 }
  0x65   :  { %607 = vmatpush3.bf16.msra.mxu1 %v675_v26 }
  0x66   :  { %608 = vmatprep.subr.bf16.mxu1 %v814_v2 }
  0x67   :  { %589 = vmatpush3.bf16.msra.mxu0 %v668_v16 }
  0x68   :  { %590 = vmatprep.subr.bf16.mxu0 %v814_v2 }
  0x69   :  { %609 = vmatpush3.bf16.msra.mxu1 %v676_v27 }
  0x6a   :  { %610 = vmatprep.subr.bf16.mxu1 %v814_v2 }
  0x6b   :  { %591 = vmatpush3.bf16.msra.mxu0 %v669_v18 }
  0x6c   :  { %616 = vmatprep.subr.bf16.mxu0 %v814_v2 }
  0x6d   :  { %611 = vmatpush3.bf16.msra.mxu1 %v677_v54 }
  0x75   :  { %265 = vadd.xlane.f32.xlu0 %v264_v24 }
  0xcb   :  { %v107_v29 = vpop.permute.xlu1 %106  ;;  %v93_v30 = vpop.permute.xlu0 %92 }
  0xcc   :  { %vm94_vm3 = vcmp.eq.s32.totalorder %v93_v30, %v88_v31  ;;  %vm108_vm4 = vcmp.eq.s32.totalorder %v107_v29, %v88_v31 }
  0xcd   :  { %v514_v34 = vsel %vm94_vm3, 1.0, %v814_v2  ;;  %v516_v37 = vsel %vm108_vm4, 1.0, %v814_v2 }
  0xd0   :  { %v114_v32 = vpop.permute.xlu1 %113  ;;  %v100_v33 = vpop.permute.xlu0 %99 }
  0xd1   :  { %vm101_vm5 = vcmp.eq.s32.totalorder %v100_v33, %v88_v31  ;;  %vm115_vm6 = vcmp.eq.s32.totalorder %v114_v32, %v88_v31 }
  0xd2   :  { %v515_v35 = vsel %vm101_vm5, 1.0, %v814_v2  ;;  %v517_v41 = vsel %vm115_vm6, 1.0, %v814_v2 }
  0xd3   :  { %v104_v36 = vadd.f32 %v515_v35, %v514_v34 }
  0xd5   :  { %v111_v38 = vadd.f32 %v516_v37, %v104_v36  ;;  %v121_v39 = vpop.permute.xlu1 %120  ;;  %v128_v40 = vpop.permute.xlu0 %127 }
  0xd6   :  { %vm122_vm7 = vcmp.eq.s32.totalorder %v121_v39, %v88_v31  ;;  %vm129_vm8 = vcmp.eq.s32.totalorder %v128_v40, %v88_v31 }
  0xd7   :  { %v118_v42 = vadd.f32 %v517_v41, %v111_v38  ;;  %v518_v43 = vsel %vm122_vm7, 1.0, %v814_v2  ;;  %v519_v45 = vsel %vm129_vm8, 1.0, %v814_v2 }
  0xd9   :  { %v125_v44 = vadd.f32 %v518_v43, %v118_v42 }
  0xda   :  { %v135_v46 = vpop.permute.xlu1 %134 }
  0xdb   :  { %vm136_vm9 = vcmp.eq.s32.totalorder %v135_v46, %v88_v31  ;;  %v132_v47 = vadd.f32 %v519_v45, %v125_v44 }
  0xdc   :  { %v520_v48 = vsel %vm136_vm9, 1.0, %v814_v2 }
  0xdd   :  { %v139_v50 = vadd.f32 %v520_v48, %v132_v47 }
  0xdf   :  { %v142_v49 = vpop.permute.xlu1 %141 }
  0xe0   :  { %vm143_vm10 = vcmp.eq.s32.totalorder %v142_v49, %v88_v31 }
  0xe1   :  { %v521_v51 = vsel %vm143_vm10, 1.0, %v814_v2 }
  0xe2   :  { %v146_v52 = vadd.f32 %v521_v51, %v139_v50 }
  0xe4   :  { %v148_v53 = vpack.c.bf16 %v146_v52, %v146_v52 }
  0xe6   :  { %593 = vmatmul.mubr.bf16.vlgmr.msra.gmra.mrb[0].mxu0 %v148_v53 }
  0xe7   :  { %632 = vmatprep.mubr.msk.bf16.mxu0 %vm821_vm0, %v814_v2  ;;  %617 = vmatpush3.bf16.msra.mxu0 %v678_v55 }
  0xe8   :  { %618 = vmatprep.subr.bf16.mxu0 %v814_v2 }
  0xeb   :  { %619 = vmatpush3.bf16.msra.mxu0 %v679_v56 }
  0xec   :  { %620 = vmatprep.subr.bf16.mxu0 %v814_v2 }
  0xef   :  { %621 = vmatpush3.bf16.msra.mxu0 %v680_v57 }
  0xf0   :  { %622 = vmatprep.subr.bf16.mxu0 %v814_v2 }
  0xf3   :  { %623 = vmatpush3.bf16.msra.mxu0 %v681_v58 }
  0xf4   :  { %624 = vmatprep.subr.bf16.mxu0 %v814_v2 }
  0xf7   :  { %625 = vmatpush3.bf16.msra.mxu0 %v682_v59 }
  0xf8   :  { %626 = vmatprep.subr.bf16.mxu0 %v814_v2 }
  0xfb   :  { %627 = vmatpush3.bf16.msra.mxu0 %v683_v60 }
  0xfc   :  { %628 = vmatprep.subr.bf16.mxu0 %v814_v2 }
  0xff   :  { %629 = vmatpush3.bf16.msra.mxu0 %v684_v7 }
 0x100   :  { %630 = vmatprep.subr.bf16.mxu0 %v814_v2 }
 0x102   :  { %v266_v61 = vpop.xlane.xlu0 %265 }
 0x103   :  { %v267_v62 = vmax.f32 %v266_v61, 1.0  ;;  %631 = vmatpush3.bf16.msra.mxu0 %v685_v8 }
 0x105   :  { %686 = vrcp.f32 %v267_v62 }
 0x10f   :  { %v687_v63 = vpop.eup %686 }
 0x1b9   :  { %v247_v0 = vpop.f32.mrb[0].mxu0 }
 0x1ba   :  { %v270_v1 = vmul.f32 %v687_v63, %v247_v0  ;;  %v594_v3 = vpop.f32.mrb[1].mxu0 }
 0x1bb   :  { %v250_v4 = vpop.f32.mrb[2].mxu0 }
 0x1bc   :  { %v271_v5 = vpack.c.bf16 %v270_v1, %v270_v1  ;;  %v595_v6 = vpop.f32.mrb[3].mxu0 }
 0x1be   :  { %613 = vmatmul.mubr.bf16.vlgmr.msra.gmra.mrb[0].mxu1 %v271_v5 }
 0x291   :  { %v377_v10 = vpop.f32.mrb[0].mxu1 }
 0x292   :  { %v378_v11 = vadd.f32 %v531_v9, %v377_v10  ;;  %v614_v12 = vpop.f32.mrb[1].mxu1 }
 0x293   :  { %v380_v13 = vpop.f32.mrb[2].mxu1 }
 0x294   :  { %v383_v14 = vmax.f32 %v378_v11, 0.0  ;;  %v615_v15 = vpop.f32.mrb[3].mxu1 }
 0x296   :  { %v384_v16 = vpack.c.bf16 %v383_v14, %v383_v14 }
 0x298   :  { %633 = vmatmul.mubr.bf16.vlgmr.msra.gmra.mrb[4].mxu0 %v384_v16 }
 0x36b   :  { %v490_v2 = vpop.f32.mrb[4].mxu0 }
 0x36c   :  { %v491_v18 = vadd.f32 %v540_v17, %v490_v2  ;;  %v634_v19 = vpop.f32.mrb[5].mxu0 }
 0x36d   :  { %v493_v20 = vpop.f32.mrb[6].mxu0 }
 0x36e   :  { %496 = vst [vmem:[#allocation13] sm:$0xff] %v491_v18  ;;  %v635_v21 = vpop.f32.mrb[7].mxu0 }
 0x36f   :  { %787 = shalt.err (!%p784_p8)
}
 0x370   :  { %s788_s6 = scalar_lea.hbm %s987_s7, 128 }
 0x371   :  { %p789_p9 = scmp.ne.s32.totalorder %s987_s7, %s788_s6  ;;  %p792_p10 = scmp.lt.u32.totalorder %s788_s6, %s987_s7 }
 0x373   :  { %p794_p11 = pnand %p792_p10, %p789_p9 }
 0x375   :  { %797 = shalt.err (!%p794_p11)
}
 0x376   :  { %506 = dma.vmem_to_hbm [thread:$0]  %s504_s29, 128, %s987_s7, [#allocation7]  }
 0x377   :  { %804 = dma.done.wait [#allocation7], 128  }
 0x378   :  { %805 = vsyncadd [#allocation7], 4294967168 }
 0x379   :  { %510 = vsyncpa [#allocation6], 1 }
 0x37a   :  { %511 = vsyncpa [#allocation9], 1 }
 0x37b   :  { %512 = vsyncpa [#allocation12], 1 }
 0x37c   :  { %513 = vsyncpa [#allocation7], 1 }

</bundles_post_ra>
